<compile_context>
chip_gen: v5e
topology: v5e:2x2
jax: 0.10.0
libtpu: 0.0.40
codegen_flags: <defaults>
</compile_context>

<pallas_src>
import jax
import jax.numpy as jnp
from jax import lax
from jax.experimental import pallas as pl
from jax.experimental.pallas import tpu as pltpu


_NSEM = 8  # max outstanding row-gather DMAs


def _round_up(x, m):
    return (x + m - 1) // m * m


def _embedbag_fc_kernel(text_ref,     # SMEM scalar-prefetch: [T_pad] int32 token ids
                        seg_ref,      # VMEM: [1, T_pad] int32 bag id per token (-1 = pad)
                        emb_hbm,      # HBM (pl.ANY): [vocab, D] embedding table
                        w_ref,        # VMEM: [D, C_pad]  fc weight (transposed, lane-padded)
                        b_ref,        # VMEM: [1, C_pad]  fc bias (lane-padded)
                        out_ref,      # VMEM out: [B_pad, C_pad]
                        rows_ref,     # VMEM scratch: [T_pad, D] gathered embedding rows
                        sem):         # DMA semaphores: (_NSEM,)
    t_pad = rows_ref.shape[0]
    b_pad = out_ref.shape[0]

    def _start(t, slot):
        idx = text_ref[t]
        pltpu.make_async_copy(
            emb_hbm.at[pl.ds(idx, 1), :],
            rows_ref.at[pl.ds(t, 1), :],
            sem.at[slot]).start()

    def _wait(t, slot):
        pltpu.make_async_copy(
            emb_hbm.at[pl.ds(0, 1), :],           # shape-only placeholder src
            rows_ref.at[pl.ds(t, 1), :],
            sem.at[slot]).wait()

    # Prime up to _NSEM outstanding row-gather DMAs (table stays in HBM).
    for t in range(min(_NSEM, t_pad)):
        _start(t, t % _NSEM)

    # Build the mean-pooling segment matrix on the VPU while the DMAs fly:
    #   m[b, t] = (seg[t] == b) / count(b)        (empty bag -> all-zero row)
    seg = seg_ref[...]                                              # [1, T_pad]
    bag_iota = lax.broadcasted_iota(jnp.int32, (b_pad, t_pad), 0)   # [B_pad, T_pad]
    hit = (seg == bag_iota).astype(jnp.float32)                     # [B_pad, T_pad]
    counts = jnp.sum(hit, axis=1, keepdims=True)                    # [B_pad, 1]
    inv = 1.0 / jnp.maximum(counts, 1.0)
    m = hit * inv                                                   # [B_pad, T_pad]

    # Drain the gather pipeline: wait row t, immediately re-issue row t+_NSEM.
    def drain_body(t, carry):
        slot = t % _NSEM
        _wait(t, slot)

        @pl.when(t + _NSEM < t_pad)
        def _():
            _start(t + _NSEM, slot)

        return carry

    lax.fori_loop(0, t_pad, drain_body, 0)

    # Mean pool on the MXU:  pooled = M @ rows          -> [B_pad, D]
    pooled = jnp.dot(m, rows_ref[...].astype(jnp.float32),
                     preferred_element_type=jnp.float32)

    # Linear (lane-dense padded output):  out = pooled @ W^T + bias
    out_ref[...] = (jnp.dot(pooled, w_ref[...],
                            preferred_element_type=jnp.float32)
                    + b_ref[...])


def text_classification_forward(text, offsets, emb_table, fc_weight, fc_bias):
    """
    text      : int32 [total_tokens]   flattened token indices
    offsets   : int32 [num_bags]       start offset of each bag (offsets[0] == 0)
    emb_table : f32   [vocab, D]
    fc_weight : f32   [num_class, D]   (PyTorch Linear convention)
    fc_bias   : f32   [num_class]
    returns   : f32   [num_bags, num_class]
    """
    total_tokens = text.shape[0]
    num_bags = offsets.shape[0]
    vocab_size, embed_dim = emb_table.shape
    num_class = fc_weight.shape[0]

    # ---- host-side glue: padding / layout only (no model compute hoisted) ----
    t_pad = max(_NSEM, _round_up(max(total_tokens, 1), 8))
    b_pad = _round_up(num_bags, 8)          # sublane-aligned bag tile
    c_pad = _round_up(num_class, 128)       # lane-dense output

    text = text.astype(jnp.int32)
    offsets = offsets.astype(jnp.int32)

    # bag id per token; -1 marks padded token slots
    seg = (jnp.searchsorted(offsets,
                            jnp.arange(total_tokens, dtype=jnp.int32),
                            side="right").astype(jnp.int32) - 1)
    seg_p = jnp.full((1, t_pad), -1, dtype=jnp.int32).at[0, :total_tokens].set(seg)
    text_p = jnp.zeros((t_pad,), jnp.int32).at[:total_tokens].set(text)

    w_t = jnp.zeros((embed_dim, c_pad), jnp.float32).at[:, :num_class].set(fc_weight.T)
    b_row = jnp.zeros((1, c_pad), jnp.float32).at[:, :num_class].set(fc_bias)

    grid_spec = pltpu.PrefetchScalarGridSpec(
        num_scalar_prefetch=1,
        grid=(1,),
        in_specs=[
            pl.BlockSpec((1, t_pad), lambda i, txt: (0, 0)),           # seg ids
            pl.BlockSpec(memory_space=pl.ANY),                         # emb table (HBM)
            pl.BlockSpec((embed_dim, c_pad), lambda i, txt: (0, 0)),   # fc weight^T
            pl.BlockSpec((1, c_pad), lambda i, txt: (0, 0)),           # fc bias
        ],
        out_specs=pl.BlockSpec((b_pad, c_pad), lambda i, txt: (0, 0)),
        scratch_shapes=[
            pltpu.VMEM((t_pad, embed_dim), emb_table.dtype),           # gathered rows
            pltpu.SemaphoreType.DMA((_NSEM,)),
        ],
    )

    cost = pl.CostEstimate(
        flops=2 * b_pad * t_pad * embed_dim + 2 * b_pad * embed_dim * c_pad,
        transcendentals=0,
        bytes_accessed=4 * (t_pad * embed_dim + embed_dim * c_pad
                            + b_pad * c_pad + t_pad),
    )

    out = pl.pallas_call(
        _embedbag_fc_kernel,
        out_shape=jax.ShapeDtypeStruct((b_pad, c_pad), jnp.float32),
        grid_spec=grid_spec,
        compiler_params=pltpu.CompilerParams(
            dimension_semantics=("arbitrary",)),
        cost_estimate=cost,
    )(text_p, seg_p, emb_table.astype(jnp.float32), w_t, b_row)

    return out[:num_bags, :num_class]


if __name__ == "__main__":
    # Small shapes consistent with the module: vocab=32, embed_dim=32, num_class=4
    vocab_size, embed_dim, num_class = 32, 32, 4
    num_bags, total_tokens = 2, 8

    key = jax.random.PRNGKey(0)
    k_emb, k_w, k_txt = jax.random.split(key, 3)

    # init_weights(): uniform(-0.5, 0.5) for embedding & fc weight, zero bias
    emb_table = jax.random.uniform(k_emb, (vocab_size, embed_dim),
                                   jnp.float32, -0.5, 0.5)
    fc_weight = jax.random.uniform(k_w, (num_class, embed_dim),
                                   jnp.float32, -0.5, 0.5)
    fc_bias = jnp.zeros((num_class,), jnp.float32)

    # text: flattened token ids; offsets: bag starts (bag0: tokens[0:5], bag1: tokens[5:8])
    text = jax.random.randint(k_txt, (total_tokens,), 0, vocab_size, jnp.int32)
    offsets = jnp.array([0, 5], dtype=jnp.int32)

    out = text_classification_forward(text, offsets, emb_table, fc_weight, fc_bias)
    out = jax.block_until_ready(out)

    # pure-JAX reference: EmbeddingBag(mode='mean') + Linear
    ends = jnp.concatenate([offsets[1:], jnp.array([total_tokens], jnp.int32)])
    pooled_rows = []
    for b in range(num_bags):
        s, e = int(offsets[b]), int(ends[b])
        pooled_rows.append(emb_table[text[s:e]].mean(axis=0))
    expected = jnp.stack(pooled_rows) @ fc_weight.T + fc_bias

    assert out.shape == (num_bags, num_class)
    assert jnp.allclose(out, expected, atol=1e-5, rtol=1e-5), (out, expected)

    print("KERNEL_OK")
</pallas_src>

<mosaic_0001>
module attributes {stable_mosaic.version = 11 : i64} {
  func.func @_embedbag_fc_kernel(%arg0: i32, %arg1: memref<8xi32, #tpu.memory_space<smem>>, %arg2: memref<1x8xi32, #tpu.memory_space<vmem>>, %arg3: memref<32x32xf32, #tpu.memory_space<any>>, %arg4: memref<32x128xf32, #tpu.memory_space<vmem>>, %arg5: memref<1x128xf32, #tpu.memory_space<vmem>>, %arg6: memref<8x128xf32, #tpu.memory_space<vmem>>, %arg7: memref<8x32xf32, #tpu.memory_space<vmem>>, %arg8: memref<8x!tpu.dma_semaphore, #tpu.memory_space<semaphore_mem>>) attributes {dimension_semantics = [#tpu.dimension_semantics<arbitrary>], iteration_bounds = array<i64: 1>, scalar_prefetch = 1 : i64, scratch_operands = 2 : i64, tpu.core_type = #tpu.core_type<tc>, window_params = [{pipeline_mode = #tpu.pipeline_mode<synchronous>, transform_indices = @transform_0, window_bounds = array<i64: 1, 8>}, {}, {pipeline_mode = #tpu.pipeline_mode<synchronous>, transform_indices = @transform_2, window_bounds = array<i64: 32, 128>}, {pipeline_mode = #tpu.pipeline_mode<synchronous>, transform_indices = @transform_3, window_bounds = array<i64: 1, 128>}, {pipeline_mode = #tpu.pipeline_mode<synchronous>, transform_indices = @transform_4, window_bounds = array<i64: 8, 128>}]} {
    %c0 = arith.constant 0 : index
    %0 = memref.load %arg1[%c0] : memref<8xi32, #tpu.memory_space<smem>>
    %c0_i32 = arith.constant 0 : i32
    %c0_i32_0 = arith.constant 0 : i32
    %1 = tpu.memref_slice %arg3[%0, %c0_i32_0] : memref<32x32xf32, #tpu.memory_space<any>> -> memref<1x32xf32, #tpu.memory_space<any>>
    %c0_i32_1 = arith.constant 0 : i32
    %c0_i32_2 = arith.constant 0 : i32
    %2 = tpu.memref_slice %arg7[%c0_i32_1, %c0_i32_2] : memref<8x32xf32, #tpu.memory_space<vmem>> -> memref<1x32xf32, #tpu.memory_space<vmem>>
    %3 = tpu.memref_slice %arg8[%c0_i32] : memref<8x!tpu.dma_semaphore, #tpu.memory_space<semaphore_mem>> -> memref<1x!tpu.dma_semaphore, #tpu.memory_space<semaphore_mem>>
    %4 = tpu.memref_squeeze %3 : memref<1x!tpu.dma_semaphore, #tpu.memory_space<semaphore_mem>> -> memref<!tpu.dma_semaphore, #tpu.memory_space<semaphore_mem>>
    tpu.enqueue_dma source(%1 : memref<1x32xf32, #tpu.memory_space<any>>) target(%2 : memref<1x32xf32, #tpu.memory_space<vmem>>) target_semaphore(%4 : memref<!tpu.dma_semaphore, #tpu.memory_space<semaphore_mem>>)
    %c1 = arith.constant 1 : index
    %5 = memref.load %arg1[%c1] : memref<8xi32, #tpu.memory_space<smem>>
    %c1_i32 = arith.constant 1 : i32
    %c0_i32_3 = arith.constant 0 : i32
    %6 = tpu.memref_slice %arg3[%5, %c0_i32_3] : memref<32x32xf32, #tpu.memory_space<any>> -> memref<1x32xf32, #tpu.memory_space<any>>
    %c1_i32_4 = arith.constant 1 : i32
    %c0_i32_5 = arith.constant 0 : i32
    %7 = tpu.memref_slice %arg7[%c1_i32_4, %c0_i32_5] : memref<8x32xf32, #tpu.memory_space<vmem>> -> memref<1x32xf32, #tpu.memory_space<vmem>>
    %8 = tpu.memref_slice %arg8[%c1_i32] : memref<8x!tpu.dma_semaphore, #tpu.memory_space<semaphore_mem>> -> memref<1x!tpu.dma_semaphore, #tpu.memory_space<semaphore_mem>>
    %9 = tpu.memref_squeeze %8 : memref<1x!tpu.dma_semaphore, #tpu.memory_space<semaphore_mem>> -> memref<!tpu.dma_semaphore, #tpu.memory_space<semaphore_mem>>
    tpu.enqueue_dma source(%6 : memref<1x32xf32, #tpu.memory_space<any>>) target(%7 : memref<1x32xf32, #tpu.memory_space<vmem>>) target_semaphore(%9 : memref<!tpu.dma_semaphore, #tpu.memory_space<semaphore_mem>>)
    %c2 = arith.constant 2 : index
    %10 = memref.load %arg1[%c2] : memref<8xi32, #tpu.memory_space<smem>>
    %c2_i32 = arith.constant 2 : i32
    %c0_i32_6 = arith.constant 0 : i32
    %11 = tpu.memref_slice %arg3[%10, %c0_i32_6] : memref<32x32xf32, #tpu.memory_space<any>> -> memref<1x32xf32, #tpu.memory_space<any>>
    %c2_i32_7 = arith.constant 2 : i32
    %c0_i32_8 = arith.constant 0 : i32
    %12 = tpu.memref_slice %arg7[%c2_i32_7, %c0_i32_8] : memref<8x32xf32, #tpu.memory_space<vmem>> -> memref<1x32xf32, #tpu.memory_space<vmem>>
    %13 = tpu.memref_slice %arg8[%c2_i32] : memref<8x!tpu.dma_semaphore, #tpu.memory_space<semaphore_mem>> -> memref<1x!tpu.dma_semaphore, #tpu.memory_space<semaphore_mem>>
    %14 = tpu.memref_squeeze %13 : memref<1x!tpu.dma_semaphore, #tpu.memory_space<semaphore_mem>> -> memref<!tpu.dma_semaphore, #tpu.memory_space<semaphore_mem>>
    tpu.enqueue_dma source(%11 : memref<1x32xf32, #tpu.memory_space<any>>) target(%12 : memref<1x32xf32, #tpu.memory_space<vmem>>) target_semaphore(%14 : memref<!tpu.dma_semaphore, #tpu.memory_space<semaphore_mem>>)
    %c3 = arith.constant 3 : index
    %15 = memref.load %arg1[%c3] : memref<8xi32, #tpu.memory_space<smem>>
    %c3_i32 = arith.constant 3 : i32
    %c0_i32_9 = arith.constant 0 : i32
    %16 = tpu.memref_slice %arg3[%15, %c0_i32_9] : memref<32x32xf32, #tpu.memory_space<any>> -> memref<1x32xf32, #tpu.memory_space<any>>
    %c3_i32_10 = arith.constant 3 : i32
    %c0_i32_11 = arith.constant 0 : i32
    %17 = tpu.memref_slice %arg7[%c3_i32_10, %c0_i32_11] : memref<8x32xf32, #tpu.memory_space<vmem>> -> memref<1x32xf32, #tpu.memory_space<vmem>>
    %18 = tpu.memref_slice %arg8[%c3_i32] : memref<8x!tpu.dma_semaphore, #tpu.memory_space<semaphore_mem>> -> memref<1x!tpu.dma_semaphore, #tpu.memory_space<semaphore_mem>>
    %19 = tpu.memref_squeeze %18 : memref<1x!tpu.dma_semaphore, #tpu.memory_space<semaphore_mem>> -> memref<!tpu.dma_semaphore, #tpu.memory_space<semaphore_mem>>
    tpu.enqueue_dma source(%16 : memref<1x32xf32, #tpu.memory_space<any>>) target(%17 : memref<1x32xf32, #tpu.memory_space<vmem>>) target_semaphore(%19 : memref<!tpu.dma_semaphore, #tpu.memory_space<semaphore_mem>>)
    %c4 = arith.constant 4 : index
    %20 = memref.load %arg1[%c4] : memref<8xi32, #tpu.memory_space<smem>>
    %c4_i32 = arith.constant 4 : i32
    %c0_i32_12 = arith.constant 0 : i32
    %21 = tpu.memref_slice %arg3[%20, %c0_i32_12] : memref<32x32xf32, #tpu.memory_space<any>> -> memref<1x32xf32, #tpu.memory_space<any>>
    %c4_i32_13 = arith.constant 4 : i32
    %c0_i32_14 = arith.constant 0 : i32
    %22 = tpu.memref_slice %arg7[%c4_i32_13, %c0_i32_14] : memref<8x32xf32, #tpu.memory_space<vmem>> -> memref<1x32xf32, #tpu.memory_space<vmem>>
    %23 = tpu.memref_slice %arg8[%c4_i32] : memref<8x!tpu.dma_semaphore, #tpu.memory_space<semaphore_mem>> -> memref<1x!tpu.dma_semaphore, #tpu.memory_space<semaphore_mem>>
    %24 = tpu.memref_squeeze %23 : memref<1x!tpu.dma_semaphore, #tpu.memory_space<semaphore_mem>> -> memref<!tpu.dma_semaphore, #tpu.memory_space<semaphore_mem>>
    tpu.enqueue_dma source(%21 : memref<1x32xf32, #tpu.memory_space<any>>) target(%22 : memref<1x32xf32, #tpu.memory_space<vmem>>) target_semaphore(%24 : memref<!tpu.dma_semaphore, #tpu.memory_space<semaphore_mem>>)
    %c5 = arith.constant 5 : index
    %25 = memref.load %arg1[%c5] : memref<8xi32, #tpu.memory_space<smem>>
    %c5_i32 = arith.constant 5 : i32
    %c0_i32_15 = arith.constant 0 : i32
    %26 = tpu.memref_slice %arg3[%25, %c0_i32_15] : memref<32x32xf32, #tpu.memory_space<any>> -> memref<1x32xf32, #tpu.memory_space<any>>
    %c5_i32_16 = arith.constant 5 : i32
    %c0_i32_17 = arith.constant 0 : i32
    %27 = tpu.memref_slice %arg7[%c5_i32_16, %c0_i32_17] : memref<8x32xf32, #tpu.memory_space<vmem>> -> memref<1x32xf32, #tpu.memory_space<vmem>>
    %28 = tpu.memref_slice %arg8[%c5_i32] : memref<8x!tpu.dma_semaphore, #tpu.memory_space<semaphore_mem>> -> memref<1x!tpu.dma_semaphore, #tpu.memory_space<semaphore_mem>>
    %29 = tpu.memref_squeeze %28 : memref<1x!tpu.dma_semaphore, #tpu.memory_space<semaphore_mem>> -> memref<!tpu.dma_semaphore, #tpu.memory_space<semaphore_mem>>
    tpu.enqueue_dma source(%26 : memref<1x32xf32, #tpu.memory_space<any>>) target(%27 : memref<1x32xf32, #tpu.memory_space<vmem>>) target_semaphore(%29 : memref<!tpu.dma_semaphore, #tpu.memory_space<semaphore_mem>>)
    %c6 = arith.constant 6 : index
    %30 = memref.load %arg1[%c6] : memref<8xi32, #tpu.memory_space<smem>>
    %c6_i32 = arith.constant 6 : i32
    %c0_i32_18 = arith.constant 0 : i32
    %31 = tpu.memref_slice %arg3[%30, %c0_i32_18] : memref<32x32xf32, #tpu.memory_space<any>> -> memref<1x32xf32, #tpu.memory_space<any>>
    %c6_i32_19 = arith.constant 6 : i32
    %c0_i32_20 = arith.constant 0 : i32
    %32 = tpu.memref_slice %arg7[%c6_i32_19, %c0_i32_20] : memref<8x32xf32, #tpu.memory_space<vmem>> -> memref<1x32xf32, #tpu.memory_space<vmem>>
    %33 = tpu.memref_slice %arg8[%c6_i32] : memref<8x!tpu.dma_semaphore, #tpu.memory_space<semaphore_mem>> -> memref<1x!tpu.dma_semaphore, #tpu.memory_space<semaphore_mem>>
    %34 = tpu.memref_squeeze %33 : memref<1x!tpu.dma_semaphore, #tpu.memory_space<semaphore_mem>> -> memref<!tpu.dma_semaphore, #tpu.memory_space<semaphore_mem>>
    tpu.enqueue_dma source(%31 : memref<1x32xf32, #tpu.memory_space<any>>) target(%32 : memref<1x32xf32, #tpu.memory_space<vmem>>) target_semaphore(%34 : memref<!tpu.dma_semaphore, #tpu.memory_space<semaphore_mem>>)
    %c7 = arith.constant 7 : index
    %35 = memref.load %arg1[%c7] : memref<8xi32, #tpu.memory_space<smem>>
    %c7_i32 = arith.constant 7 : i32
    %c0_i32_21 = arith.constant 0 : i32
    %36 = tpu.memref_slice %arg3[%35, %c0_i32_21] : memref<32x32xf32, #tpu.memory_space<any>> -> memref<1x32xf32, #tpu.memory_space<any>>
    %c7_i32_22 = arith.constant 7 : i32
    %c0_i32_23 = arith.constant 0 : i32
    %37 = tpu.memref_slice %arg7[%c7_i32_22, %c0_i32_23] : memref<8x32xf32, #tpu.memory_space<vmem>> -> memref<1x32xf32, #tpu.memory_space<vmem>>
    %38 = tpu.memref_slice %arg8[%c7_i32] : memref<8x!tpu.dma_semaphore, #tpu.memory_space<semaphore_mem>> -> memref<1x!tpu.dma_semaphore, #tpu.memory_space<semaphore_mem>>
    %39 = tpu.memref_squeeze %38 : memref<1x!tpu.dma_semaphore, #tpu.memory_space<semaphore_mem>> -> memref<!tpu.dma_semaphore, #tpu.memory_space<semaphore_mem>>
    tpu.enqueue_dma source(%36 : memref<1x32xf32, #tpu.memory_space<any>>) target(%37 : memref<1x32xf32, #tpu.memory_space<vmem>>) target_semaphore(%39 : memref<!tpu.dma_semaphore, #tpu.memory_space<semaphore_mem>>)
    %c0_24 = arith.constant 0 : index
    %c0_25 = arith.constant 0 : index
    %40 = vector.load %arg2[%c0_24, %c0_25] : memref<1x8xi32, #tpu.memory_space<vmem>>, vector<1x8xi32>
    %41 = tpu.iota {dimensions = array<i32: 0>} : vector<8x8xi32>
    %42 = vector.broadcast %40 : vector<1x8xi32> to vector<8x8xi32>
    %43 = arith.cmpi eq, %42, %41 : vector<8x8xi32>
    %44 = arith.extui %43 : vector<8x8xi1> to vector<8x8xi32>
    %45 = arith.sitofp %44 : vector<8x8xi32> to vector<8x8xf32>
    %cst = arith.constant dense<0.000000e+00> : vector<8xf32>
    %46 = vector.multi_reduction <add>, %45, %cst [1] : vector<8x8xf32> to vector<8xf32>
    %47 = vector.shape_cast %46 : vector<8xf32> to vector<8x1xf32>
    %cst_26 = arith.constant 1.000000e+00 : f32
    %48 = vector.broadcast %cst_26 : f32 to vector<8x1xf32>
    %49 = arith.maximumf %47, %48 : vector<8x1xf32>
    %cst_27 = arith.constant 1.000000e+00 : f32
    %50 = vector.broadcast %cst_27 : f32 to vector<8x1xf32>
    %51 = arith.divf %50, %49 : vector<8x1xf32>
    %52 = vector.broadcast %51 : vector<8x1xf32> to vector<8x8xf32>
    %53 = arith.mulf %45, %52 : vector<8x8xf32>
    %c0_i32_28 = arith.constant 0 : i32
    %c8_i32 = arith.constant 8 : i32
    %54 = arith.addi %c0_i32_28, %c8_i32 : i32
    %c1_i32_29 = arith.constant 1 : i32
    scf.for %arg9 = %c0_i32_28 to %54 step %c1_i32_29  : i32 {
      %c8_i32_41 = arith.constant 8 : i32
      %c0_i32_42 = arith.constant 0 : i32
      %63 = arith.cmpi eq, %c8_i32_41, %c0_i32_42 : i32
      %c1_i32_43 = arith.constant 1 : i32
      %64 = arith.select %63, %c1_i32_43, %c8_i32_41 : i32
      %65 = arith.remsi %arg9, %64 : i32
      %c0_i32_44 = arith.constant 0 : i32
      %66 = arith.cmpi ne, %65, %c0_i32_44 : i32
      %c0_i32_45 = arith.constant 0 : i32
      %67 = arith.cmpi slt, %65, %c0_i32_45 : i32
      %c0_i32_46 = arith.constant 0 : i32
      %68 = arith.cmpi slt, %64, %c0_i32_46 : i32
      %69 = arith.xori %67, %68 : i1
      %70 = arith.andi %69, %66 : i1
      %71 = arith.addi %65, %64 : i32
      %72 = arith.select %70, %71, %65 : i32
      %c0_i32_47 = arith.constant 0 : i32
      %c0_i32_48 = arith.constant 0 : i32
      %73 = tpu.memref_slice %arg3[%c0_i32_47, %c0_i32_48] : memref<32x32xf32, #tpu.memory_space<any>> -> memref<1x32xf32, #tpu.memory_space<any>>
      %c0_i32_49 = arith.constant 0 : i32
      %74 = tpu.memref_slice %arg7[%arg9, %c0_i32_49] : memref<8x32xf32, #tpu.memory_space<vmem>> -> memref<1x32xf32, #tpu.memory_space<vmem>>
      %75 = tpu.memref_slice %arg8[%72] : memref<8x!tpu.dma_semaphore, #tpu.memory_space<semaphore_mem>> -> memref<1x!tpu.dma_semaphore, #tpu.memory_space<semaphore_mem>>
      %76 = tpu.memref_squeeze %75 : memref<1x!tpu.dma_semaphore, #tpu.memory_space<semaphore_mem>> -> memref<!tpu.dma_semaphore, #tpu.memory_space<semaphore_mem>>
      tpu.wait_dma2 semaphore(%76 : memref<!tpu.dma_semaphore, #tpu.memory_space<semaphore_mem>>) src(%73 : memref<1x32xf32, #tpu.memory_space<any>>) dst(%74 : memref<1x32xf32, #tpu.memory_space<vmem>>)
      %c8_i32_50 = arith.constant 8 : i32
      %77 = arith.addi %arg9, %c8_i32_50 : i32
      %c8_i32_51 = arith.constant 8 : i32
      %78 = arith.cmpi slt, %77, %c8_i32_51 : i32
      %79 = arith.extui %78 : i1 to i32
      %c0_i32_52 = arith.constant 0 : i32
      %80 = arith.cmpi ne, %79, %c0_i32_52 : i32
      scf.if %80 {
        %c8_i32_53 = arith.constant 8 : i32
        %81 = arith.addi %arg9, %c8_i32_53 : i32
        %82 = arith.index_cast %81 : i32 to index
        %83 = memref.load %arg1[%82] : memref<8xi32, #tpu.memory_space<smem>>
        %c0_i32_54 = arith.constant 0 : i32
        %84 = tpu.memref_slice %arg3[%83, %c0_i32_54] : memref<32x32xf32, #tpu.memory_space<any>> -> memref<1x32xf32, #tpu.memory_space<any>>
        %c0_i32_55 = arith.constant 0 : i32
        %85 = tpu.memref_slice %arg7[%81, %c0_i32_55] : memref<8x32xf32, #tpu.memory_space<vmem>> -> memref<1x32xf32, #tpu.memory_space<vmem>>
        %86 = tpu.memref_slice %arg8[%72] : memref<8x!tpu.dma_semaphore, #tpu.memory_space<semaphore_mem>> -> memref<1x!tpu.dma_semaphore, #tpu.memory_space<semaphore_mem>>
        %87 = tpu.memref_squeeze %86 : memref<1x!tpu.dma_semaphore, #tpu.memory_space<semaphore_mem>> -> memref<!tpu.dma_semaphore, #tpu.memory_space<semaphore_mem>>
        tpu.enqueue_dma source(%84 : memref<1x32xf32, #tpu.memory_space<any>>) target(%85 : memref<1x32xf32, #tpu.memory_space<vmem>>) target_semaphore(%87 : memref<!tpu.dma_semaphore, #tpu.memory_space<semaphore_mem>>)
      } else {
      }
    }
    %c8_i32_30 = arith.constant 8 : i32
    %c0_31 = arith.constant 0 : index
    %c0_32 = arith.constant 0 : index
    %55 = vector.load %arg7[%c0_31, %c0_32] : memref<8x32xf32, #tpu.memory_space<vmem>>, vector<8x32xf32>
    %cst_33 = arith.constant dense<0.000000e+00> : vector<8x32xf32>
    %56 = tpu.matmul %53, %55, %cst_33 {dimension_numbers = #tpu.dot_dimension_numbers<[1], [0], [0], [1], [0, 0, 1, 1], [], []>} : vector<8x8xf32>, vector<8x32xf32>, vector<8x32xf32> -> vector<8x32xf32>
    %c0_34 = arith.constant 0 : index
    %c0_35 = arith.constant 0 : index
    %57 = vector.load %arg4[%c0_34, %c0_35] : memref<32x128xf32, #tpu.memory_space<vmem>>, vector<32x128xf32>
    %cst_36 = arith.constant dense<0.000000e+00> : vector<8x128xf32>
    %58 = tpu.matmul %56, %57, %cst_36 {dimension_numbers = #tpu.dot_dimension_numbers<[1], [0], [0], [1], [0, 0, 1, 1], [], []>} : vector<8x32xf32>, vector<32x128xf32>, vector<8x128xf32> -> vector<8x128xf32>
    %c0_37 = arith.constant 0 : index
    %c0_38 = arith.constant 0 : index
    %59 = vector.load %arg5[%c0_37, %c0_38] : memref<1x128xf32, #tpu.memory_space<vmem>>, vector<1x128xf32>
    %60 = vector.broadcast %59 : vector<1x128xf32> to vector<8x128xf32>
    %61 = arith.addf %58, %60 : vector<8x128xf32>
    %c0_39 = arith.constant 0 : index
    %c0_40 = arith.constant 0 : index
    %62 = vector.load %arg6[%c0_39, %c0_40] : memref<8x128xf32, #tpu.memory_space<vmem>>, vector<8x128xf32>
    tpu.vector_store %arg6[%c0_39, %c0_40], %61 {strides = array<i32>} : memref<8x128xf32, #tpu.memory_space<vmem>>, vector<8x128xf32>,
    return
  }
  func.func @transform_0(%arg0: i32, %arg1: memref<8xi32, #tpu.memory_space<smem>>) -> (i32, i32) {
    %c0_i32 = arith.constant 0 : i32
    %c0_i32_0 = arith.constant 0 : i32
    %c0_i32_1 = arith.constant 0 : i32
    return %c0_i32, %c0_i32_0 : i32, i32
  }
  func.func @transform_2(%arg0: i32, %arg1: memref<8xi32, #tpu.memory_space<smem>>) -> (i32, i32) {
    %c0_i32 = arith.constant 0 : i32
    %c0_i32_0 = arith.constant 0 : i32
    %c0_i32_1 = arith.constant 0 : i32
    return %c0_i32, %c0_i32_0 : i32, i32
  }
  func.func @transform_3(%arg0: i32, %arg1: memref<8xi32, #tpu.memory_space<smem>>) -> (i32, i32) {
    %c0_i32 = arith.constant 0 : i32
    %c0_i32_0 = arith.constant 0 : i32
    %c0_i32_1 = arith.constant 0 : i32
    return %c0_i32, %c0_i32_0 : i32, i32
  }
  func.func @transform_4(%arg0: i32, %arg1: memref<8xi32, #tpu.memory_space<smem>>) -> (i32, i32) {
    %c0_i32 = arith.constant 0 : i32
    %c0_i32_0 = arith.constant 0 : i32
    %c0_i32_1 = arith.constant 0 : i32
    return %c0_i32, %c0_i32_0 : i32, i32
  }
}

</mosaic_0001>

<bundles_post_ra>
// kernel: tpu_custom_call.1
= control target key start
LH: loop header
LB: loop body
LE: loop exit
PB: predicated region body
PF: predicated region fallthrough
CT: control target
= control target key end

     0   :  { %s783_s21 = smov [#allocation5]   ;;  %s971_s0 = inlined_call_operand.hbm [shape: s32[8], index: 0, kind: input, shape index: {}]   ;;  %s972_s1 = inlined_call_operand.hbm [shape: s32[1,8], index: 1, kind: input, shape index: {}]   ;;  %s973_s2 = inlined_call_operand.hbm [shape: f32[32,32], index: 2, kind: input, shape index: {}]   ;;  %s974_s3 = inlined_call_operand.hbm [shape: f32[32,128], index: 3, kind: input, shape index: {}]   ;;  %s975_s4 = inlined_call_operand.vmem [shape: f32[1,128], index: 4, kind: input, shape index: {}]   ;;  %s976_s5 = inlined_call_operand.hbm [shape: f32[8,128], index: 5, kind: output, shape index: {}]  }
   0x1   :  { %s11_s20 = sshll.u32 %s971_s0, 4  ;;  %s12_s20 = int_to_ptr.hbm [resolvable:$true] %s11_s20 }
   0x2   :  { %14 = dma.hbm_to_smem %s12_s20, 16, %s783_s21, [#allocation4] }
   0x3   :  { %769 = dma.done.wait [#allocation4], 16 }
   0x4   :  { %770 = vsyncadd [#allocation4], 4294967280 }
   0x5   :  { %17 = sfence }
   0x6   :  { %18 = vsyncpa [#allocation7], 0 }
   0x7   :  { %19 = vsyncpa [#allocation10], 0 }
   0x8   :  { %20 = vsyncpa [#allocation8], 0  ;;  %s26_s24 = sshll.u32 %s972_s1, 4  ;;  %s784_s25 = smov [#allocation6]   ;;  %s27_s24 = int_to_ptr.hbm [resolvable:$true] %s26_s24 }
   0x9   :  { %s28_s26 = sshll.u32 %s784_s25, 4  ;;  %s36_s0 = sshll.u32 %s974_s3, 4  ;;  %s29_s26 = int_to_ptr.vmem [resolvable:$true] %s28_s26  ;;  %s37_s0 = int_to_ptr.hbm [resolvable:$true] %s36_s0 }
   0xa   :  { %31 = dma.hbm_to_vmem [thread:$0]  %s27_s24, 16, %s29_s26, [#allocation7]  }
   0xb   :  { %s785_s29 = smov [#allocation9]   ;;  %s786_s6 = smov 128  }
   0xc   :  { %s38_s30 = sshll.u32 %s785_s29, 4  ;;  %s787_s7 = smov 8   ;;  %s39_s30 = int_to_ptr.vmem [resolvable:$true] %s38_s30 }
   0xd   :  { %44 = dma.hbm_to_vmem [thread:$0]  %s37_s0, 512, %s39_s30, [#allocation10], %s786_s6, %s786_s6, %s787_s7  }
   0xe   :  { %771 = dma.done.wait [#allocation7], 16  }
   0xf   :  { %772 = vsyncadd [#allocation7], 4294967280 }
  0x10   :  { %773 = dma.done.wait [#allocation10], 512  }
  0x11   :  { %774 = vsyncadd [#allocation10], 4294966784  ;;  %v190_v0 = vlaneseq  ;;  %s55_s1 = sld [smem:[#allocation5]]  ;;  %v457_v2 = vld [vmem:[#allocation6] ss:$0 sm:$0xff]  ;;  %vm196_vm0 = vcmask 64512  }
  0x12   :  { %s838_s8 = sld [smem:[#allocation5 + $0x1]]  ;;  %v788_v3 = vmov 0.0   ;;  %s789_s16 = smov [#allocation2]  }
  0x13   :  { %v191_v1 = vshrl.u32 %v190_v0, 7  ;;  %s840_s9 = sld [smem:[#allocation5 + $0x2]]  ;;  %s66_s17 = sshll.u32 %s789_s16, 4  ;;  %s67_s17 = int_to_ptr.vmem [resolvable:$true] %s66_s17 }
  0x14   :  { %s842_s3 = sld [smem:[#allocation5 + $0x3]]  ;;  %s858_s22 = scalar_lea.hbm %s973_s2, 32 }
  0x15   :  { %s844_s10 = sld [smem:[#allocation5 + $0x4]]  ;;  %vm193_vm1 = vcmp.eq.s32.totalorder %v457_v2, %v191_v1 }
  0x16   :  { %s846_s11 = sld [smem:[#allocation5 + $0x5]]  ;;  %v851_v4 = vsel %vm193_vm1, 1.0, %v788_v3 }
  0x17   :  { %s56_s14 = scalar_lea.hbm %s973_s2, %s55_s1  ;;  %v197_v5 = vsel %vm196_vm0, %v851_v4, 0.0 }
  0x18   :  { %s64_s15 = sshll.u32 %s56_s14, 4  ;;  %198 = vadd.xlane.f32.xlu0 %v197_v5  ;;  %s65_s15 = int_to_ptr.hbm [resolvable:$true] %s64_s15 }
  0x19   :  { %s521_s18 = sshra.s32 %s65_s15, 4  ;;  %s522_s18 = int_to_ptr.hbm [resolvable:$true] %s521_s18 }
  0x1a   :  { %s523_s19 = scalar_lea.hbm %s522_s18, 1  ;;  %p526_p1 = scmp.lt.s32.totalorder %s522_s18, %s973_s2 }
  0x1b   :  { %p524_p0 = scmp.ne.s32.totalorder %s522_s18, %s523_s19  ;;  %p527_p2 = scmp.lt.s32.totalorder %s858_s22, %s523_s19 }
  0x1d   :  { %p528_p3 = por %p527_p2, %p526_p1 }
  0x1f   :  { %p529_p4 = pnand %p528_p3, %p524_p0 }
  0x21   :  { %532 = shalt.err (!%p529_p4)  }
  0x22   :  { %69 = dma.hbm_to_vmem [thread:$0]  %s65_s15, 16, %s67_s17, [#allocation3] }
  0x23   :  { %s71_s27 = scalar_lea.hbm %s973_s2, %s838_s8  ;;  %s790_s0 = smov [#allocation2 + $0x1]  }
  0x24   :  { %s81_s28 = sshll.u32 %s71_s27, 4  ;;  %s83_s29 = sshll.u32 %s790_s0, 4  ;;  %s82_s28 = int_to_ptr.hbm [resolvable:$true] %s81_s28  ;;  %s84_s29 = int_to_ptr.vmem [resolvable:$true] %s83_s29 }
  0x25   :  { %s545_s30 = sshra.s32 %s82_s28, 4  ;;  %s546_s30 = int_to_ptr.hbm [resolvable:$true] %s545_s30 }
  0x26   :  { %s547_s6 = scalar_lea.hbm %s546_s30, 1  ;;  %p550_p6 = scmp.lt.s32.totalorder %s546_s30, %s973_s2 }
  0x27   :  { %p548_p5 = scmp.ne.s32.totalorder %s546_s30, %s547_s6  ;;  %p551_p7 = scmp.lt.s32.totalorder %s858_s22, %s547_s6 }
  0x29   :  { %p552_p8 = por %p551_p7, %p550_p6 }
  0x2b   :  { %p553_p9 = pnand %p552_p8, %p548_p5 }
  0x2d   :  { %556 = shalt.err (!%p553_p9)  }
  0x2e   :  { %86 = dma.hbm_to_vmem [thread:$0]  %s82_s28, 16, %s84_s29, [#allocation3 + $0x1] }
  0x2f   :  { %s88_s13 = scalar_lea.hbm %s973_s2, %s840_s9  ;;  %s791_s15 = smov [#allocation2 + $0x2]  }
  0x30   :  { %s98_s14 = sshll.u32 %s88_s13, 4  ;;  %s100_s16 = sshll.u32 %s791_s15, 4  ;;  %s99_s14 = int_to_ptr.hbm [resolvable:$true] %s98_s14  ;;  %s101_s16 = int_to_ptr.vmem [resolvable:$true] %s100_s16 }
  0x31   :  { %s569_s17 = sshra.s32 %s99_s14, 4  ;;  %s570_s17 = int_to_ptr.hbm [resolvable:$true] %s569_s17 }
  0x32   :  { %s571_s18 = scalar_lea.hbm %s570_s17, 1  ;;  %p574_p11 = scmp.lt.s32.totalorder %s570_s17, %s973_s2 }
  0x33   :  { %p572_p10 = scmp.ne.s32.totalorder %s570_s17, %s571_s18  ;;  %p575_p12 = scmp.lt.s32.totalorder %s858_s22, %s571_s18 }
  0x35   :  { %p576_p13 = por %p575_p12, %p574_p11 }
  0x37   :  { %p577_p0 = pnand %p576_p13, %p572_p10 }
  0x39   :  { %580 = shalt.err (!%p577_p0)  }
  0x3a   :  { %103 = dma.hbm_to_vmem [thread:$0]  %s99_s14, 16, %s101_s16, [#allocation3 + $0x2] }
  0x3b   :  { %s105_s23 = scalar_lea.hbm %s973_s2, %s842_s3  ;;  %s792_s25 = smov [#allocation2 + $0x3]  }
  0x3c   :  { %s115_s24 = sshll.u32 %s105_s23, 4  ;;  %s117_s26 = sshll.u32 %s792_s25, 4  ;;  %s116_s24 = int_to_ptr.hbm [resolvable:$true] %s115_s24  ;;  %s118_s26 = int_to_ptr.vmem [resolvable:$true] %s117_s26 }
  0x3d   :  { %s593_s27 = sshra.s32 %s116_s24, 4  ;;  %s594_s27 = int_to_ptr.hbm [resolvable:$true] %s593_s27 }
  0x3e   :  { %s595_s28 = scalar_lea.hbm %s594_s27, 1  ;;  %p598_p2 = scmp.lt.s32.totalorder %s594_s27, %s973_s2 }
  0x3f   :  { %p596_p1 = scmp.ne.s32.totalorder %s594_s27, %s595_s28  ;;  %p599_p3 = scmp.lt.s32.totalorder %s858_s22, %s595_s28 }
  0x41   :  { %p600_p4 = por %p599_p3, %p598_p2 }
  0x43   :  { %p601_p5 = pnand %p600_p4, %p596_p1 }
  0x45   :  { %604 = shalt.err (!%p601_p5)  }
  0x46   :  { %120 = dma.hbm_to_vmem [thread:$0]  %s116_s24, 16, %s118_s26, [#allocation3 + $0x3] }
  0x47   :  { %s122_s6 = scalar_lea.hbm %s973_s2, %s844_s10  ;;  %s793_s1 = smov [#allocation2 + $0x4]  }
  0x48   :  { %s132_s7 = sshll.u32 %s122_s6, 4  ;;  %s134_s8 = sshll.u32 %s793_s1, 4  ;;  %s133_s7 = int_to_ptr.hbm [resolvable:$true] %s132_s7  ;;  %s135_s8 = int_to_ptr.vmem [resolvable:$true] %s134_s8 }
  0x49   :  { %s617_s12 = sshra.s32 %s133_s7, 4  ;;  %s618_s12 = int_to_ptr.hbm [resolvable:$true] %s617_s12 }
  0x4a   :  { %s619_s13 = scalar_lea.hbm %s618_s12, 1  ;;  %p622_p7 = scmp.lt.s32.totalorder %s618_s12, %s973_s2 }
  0x4b   :  { %p620_p6 = scmp.ne.s32.totalorder %s618_s12, %s619_s13  ;;  %p623_p8 = scmp.lt.s32.totalorder %s858_s22, %s619_s13 }
  0x4d   :  { %p624_p9 = por %p623_p8, %p622_p7 }
  0x4f   :  { %p625_p10 = pnand %p624_p9, %p620_p6 }
  0x51   :  { %628 = shalt.err (!%p625_p10)  }
  0x52   :  { %137 = dma.hbm_to_vmem [thread:$0]  %s133_s7, 16, %s135_s8, [#allocation3 + $0x4] }
  0x53   :  { %s139_s17 = scalar_lea.hbm %s973_s2, %s846_s11  ;;  %s794_s19 = smov [#allocation2 + $0x5]  }
  0x54   :  { %s149_s18 = sshll.u32 %s139_s17, 4  ;;  %s151_s20 = sshll.u32 %s794_s19, 4  ;;  %s150_s18 = int_to_ptr.hbm [resolvable:$true] %s149_s18  ;;  %s152_s20 = int_to_ptr.vmem [resolvable:$true] %s151_s20 }
  0x55   :  { %s641_s9 = sshra.s32 %s150_s18, 4  ;;  %s642_s9 = int_to_ptr.hbm [resolvable:$true] %s641_s9 }
  0x56   :  { %s643_s21 = scalar_lea.hbm %s642_s9, 1  ;;  %p646_p12 = scmp.lt.s32.totalorder %s642_s9, %s973_s2 }
  0x57   :  { %p644_p11 = scmp.ne.s32.totalorder %s642_s9, %s643_s21  ;;  %p647_p13 = scmp.lt.s32.totalorder %s858_s22, %s643_s21 }
  0x59   :  { %p648_p0 = por %p647_p13, %p646_p12 }
  0x5b   :  { %p649_p1 = pnand %p648_p0, %p644_p11 }
  0x5d   :  { %652 = shalt.err (!%p649_p1)  }
  0x5e   :  { %154 = dma.hbm_to_vmem [thread:$0]  %s150_s18, 16, %s152_s20, [#allocation3 + $0x5] }
  0x5f   :  { %s412_s25 = sld [smem:[#allocation5 + $0x6]]  ;;  %s795_s26 = smov [#allocation2 + $0x6]  }
  0x60   :  { %s413_s11 = sld [smem:[#allocation5 + $0x7]]  ;;  %s168_s27 = sshll.u32 %s795_s26, 4  ;;  %s169_s27 = int_to_ptr.vmem [resolvable:$true] %s168_s27 }
  0x61   :  { %s796_s28 = smov [#allocation2 + $0x7]  }
  0x62   :  { %s904_s0 = sshll.u32 %s796_s28, 4  ;;  %s186_s0 = int_to_ptr.vmem [resolvable:$true] %s904_s0 }
  0x65   :  { %s156_s30 = scalar_lea.hbm %s973_s2, %s412_s25 }
  0x66   :  { %s166_s6 = sshll.u32 %s156_s30, 4  ;;  %s173_s8 = scalar_lea.hbm %s973_s2, %s413_s11  ;;  %s167_s6 = int_to_ptr.hbm [resolvable:$true] %s166_s6 }
  0x67   :  { %s183_s12 = sshll.u32 %s173_s8, 4  ;;  %s665_s13 = sshra.s32 %s167_s6, 4  ;;  %s666_s13 = int_to_ptr.hbm [resolvable:$true] %s665_s13  ;;  %s184_s12 = int_to_ptr.hbm [resolvable:$true] %s183_s12 }
  0x68   :  { %s667_s14 = scalar_lea.hbm %s666_s13, 1  ;;  %p670_p3 = scmp.lt.s32.totalorder %s666_s13, %s973_s2 }
  0x69   :  { %p668_p2 = scmp.ne.s32.totalorder %s666_s13, %s667_s14  ;;  %p671_p4 = scmp.lt.s32.totalorder %s858_s22, %s667_s14 }
  0x6b   :  { %p672_p5 = por %p671_p4, %p670_p3 }
  0x6d   :  { %p673_p6 = pnand %p672_p5, %p668_p2 }
  0x6f   :  { %676 = shalt.err (!%p673_p6)  }
  0x70   :  { %171 = dma.hbm_to_vmem [thread:$0]  %s167_s6, 16, %s169_s27, [#allocation3 + $0x6] }
  0x71   :  { %s689_s16 = sshra.s32 %s184_s12, 4  ;;  %s690_s16 = int_to_ptr.hbm [resolvable:$true] %s689_s16 }
  0x72   :  { %s691_s17 = scalar_lea.hbm %s690_s16, 1  ;;  %p694_p8 = scmp.lt.s32.totalorder %s690_s16, %s973_s2 }
  0x73   :  { %p692_p7 = scmp.ne.s32.totalorder %s690_s16, %s691_s17  ;;  %p695_p9 = scmp.lt.s32.totalorder %s858_s22, %s691_s17 }
  0x75   :  { %p696_p10 = por %p695_p9, %p694_p8 }
  0x77   :  { %p697_p11 = pnand %p696_p10, %p692_p7 }
  0x79   :  { %700 = shalt.err (!%p697_p11)  }
  0x7a   :  { %188 = dma.hbm_to_vmem [thread:$0]  %s184_s12, 16, %s186_s0, [#allocation3 + $0x7] }
  0x7b   :  { %s924_s20 = smov 0  }
  0x8b   :  { %v199_v6 = vpop.xlane.xlu0 %198 }
  0x8c   :  { %v200_v7 = vmax.f32 %v199_v6, 1.0 }
  0x8e   :  { %458 = vrcp.f32 %v200_v7  ;;  %v212_v11 = vand.u32 2147483648, %v200_v7  ;;  %v210_v13 = vand.u32 2147483647, %v200_v7  ;;  %vm206_vm3 = vweird.f32 %v200_v7 }
  0x90   :  { %v213_v15 = vor.u32 1.1754944e-38, %v212_v11  ;;  %vm211_vm5 = vcmp.eq.f32.partialorder %v210_v13, 8.507059e+37 }
  0x94   :  { %v459_v8 = vpop.eup %458 }
  0x95   :  { %v202_v9 = vmul.f32 %v459_v8, %v200_v7  ;;  %vm207_vm2 = vweird.f32 %v459_v8 }
  0x96   :  { %vm208_vm4 = vmor %vm206_vm3, %vm207_vm2 }
  0x97   :  { %v203_v10 = vsub.f32 1.0, %v202_v9 }
  0x99   :  { %v204_v12 = vmul.f32 %v459_v8, %v203_v10 }
  0x9b   :  { %v205_v14 = vadd.f32 %v459_v8, %v204_v12 }
  0x9d   :  { %v209_v16 = vsel %vm208_vm4, %v459_v8, %v205_v14 }
  0x9e   :  { %v214_v17 = vsel %vm211_vm5, %v213_v15, %v209_v16 }
  0x9f   :  { %v922_v18 = vmul.f32 %v851_v4, %v214_v17 }
  0xa0 LB: > { %p223_p12 = scmp.lt.s32.totalorder %s781_s20, 0  ;;  %s224_s9 = ssub.s32 0, %s781_s20  ;;  %s781_s20 = sphi %s924_s20, %s222_s20  }
  0xa1   : > { %s415_s21 = smin.u32 %s781_s20, %s224_s9 }
  0xa2   : > { %s226_s23 = sand.u32 7, %s415_s21  }
  0xa3   : > { %s227_s24 = ssub.s32 0, %s226_s23 }
  0xa4   : > { %s979_s24 = smov (!%p223_p12, %s227_s24), %s226_s23 }
  0xa5   : > { %p417_p13 = scmp.lt.s32.totalorder %s979_s24, 0  ;;  %s233_s25 = sadd.s32 8, %s979_s24 }
  0xa7   : > { %s981_s25 = smov (!%p417_p13, %s233_s25), %s979_s24 }
  0xa8   : > { %s932_s11 = scalar_lea.sflag [#allocation3], %s981_s25 }
  0xa9   : > { %775 = dma.done.wait %s932_s11, 16 }
  0xaa   : > { %776 = vsyncadd %s932_s11, 4294967280  ;;  %s239_s26 = sadd.s32 8, %s781_s20  ;;  %s400_s29 = scalar_lea.vmem [#allocation2], %s781_s20 }
  0xab   : > { %p937_p0 = scmp.lt.s32.totalorder %s239_s26, 8  ;;  %s401_s3 = scalar_lea.vmem %s400_s29, 8 [#allocation2] }
  0xac   : > { %s256_s30 = sshll.u32 %s401_s3, 4  ;;  %s257_s30 = int_to_ptr.vmem [resolvable:$true] %s256_s30 }
  0xad   : > { %s430_s28 = scalar_select %p937_p0, [#allocation5], [#allocation32] }
  0xae   : > { %s983_s26 = smov (!%p937_p0, %s239_s26), 0 }
  0xaf   : > { %s244_s0 = sld [smem:[%s430_s28 + %s983_s26]] }
  0xb5   : > { %s245_s1 = scalar_lea.hbm %s973_s2, %s244_s0 }
  0xb6   : > { %s254_s8 = sshll.u32 %s245_s1, 4  ;;  %s255_s8 = int_to_ptr.hbm [resolvable:$true] %s254_s8 }
  0xb7   : > { %s713_s12 = sshra.s32 %s255_s8, 4  ;;  %s714_s12 = int_to_ptr.hbm [resolvable:$true] %s713_s12 }
  0xb8   : > { %s715_s13 = scalar_lea.hbm %s714_s12, 1  ;;  %p720_p4 = scmp.lt.s32.totalorder %s714_s12, %s973_s2 }
  0xb9   : > { %p716_p1 = scmp.ne.s32.totalorder %s714_s12, %s715_s13  ;;  %p721_p5 = scmp.lt.s32.totalorder %s858_s22, %s715_s13 }
  0xbb   : > { %p717_p2 = pnand %p716_p1, %p937_p0  ;;  %p722_p6 = por %p721_p5, %p720_p4 }
  0xbd   : > { %p718_p3 = pneg %p717_p2 }
  0xbf   : > { %p723_p7 = pnand %p722_p6, %p718_p3 }
  0xc1   : > { %726 = shalt.err (!%p723_p7)  }
  0xc2   : > { %s727_s10 = sshra.s32 %s257_s30, 4  ;;  %s797_s17 = smov [#allocation2]   ;;  %s728_s10 = int_to_ptr.vmem [resolvable:$true] %s727_s10 }
  0xc3   : > { %s729_s16 = scalar_lea.vmem %s728_s10, 1  ;;  %s733_s18 = scalar_lea.vmem %s797_s17, 8 }
  0xc4   : > { %p730_p8 = scmp.ne.s32.totalorder %s728_s10, %s729_s16  ;;  %p734_p11 = scmp.lt.s32.totalorder %s728_s10, [#allocation2] }
  0xc5   : > { %p735_p12 = scmp.lt.s32.totalorder %s733_s18, %s729_s16 }
  0xc6   : > { %p731_p9 = pnand %p730_p8, %p937_p0 }
  0xc7   : > { %p736_p13 = por %p735_p12, %p734_p11 }
  0xc8   : > { %p732_p10 = pneg %p731_p9 }
  0xca   : > { %p737_p1 = pnand %p736_p13, %p732_p10 }
  0xcc   : > { %740 = shalt.err (!%p737_p1)  }
  0xcd   : > { %432 = dma.hbm_to_vmem [thread:$0]  (%p937_p0), %s255_s8, 16, %s257_s30, %s932_s11 }
  0xce   : > { %s222_s20 = sadd.s32 1, %s781_s20  }
  0xcf   : > { %p219_p2 = scmp.ge.s32.totalorder %s222_s20, 8  }
  0xd0   :  { %v260_v19 = vld [vmem:[#allocation2] sm:$0xff] (%p219_p2)  ;;  %v285_v22 = vld [vmem:[#allocation9 + $0x8] sm:$0xff] (%p219_p2)  ;;  %v284_v23 = vld [vmem:[#allocation9] sm:$0xff] (%p219_p2)  ;;  %vm292_vm6 = vcmask (%p219_p2), 261120   ;;  %s798_s2 = smov (%p219_p2), [#allocation11]   ;;  %s324_s23 = sshll.u32 (%p219_p2), %s976_s5, 4  ;;  %s325_s23 = int_to_ptr.hbm [resolvable:$true] %s324_s23 }
  0xd1   :  { %221 = sbr.rel (!%p219_p2) target bundleno = 160 (0xa0), region = 119  ;;  %v287_v20 = vld [vmem:[#allocation9 + $0x18] sm:$0xff] (%p219_p2)  ;;  %v286_v21 = vld [vmem:[#allocation9 + $0x10] sm:$0xff] (%p219_p2)  ;;  %279 = vmatpush.msra.mxu0 (%p219_p2), %v260_v19  ;;  %s322_s22 = sshll.u32 (%p219_p2), %s798_s2, 4  ;;  %s323_s22 = int_to_ptr.vmem [resolvable:$true] %s322_s22 }
  0xd2   :  { %308 = vmatpush.msra.mxu1 (%p219_p2), %v287_v20  ;;  %419 = vmatmul.msk.f32.vlgmr.msra.gmra.mxu0 (%p219_p2), %vm196_vm0, %v922_v18  ;;  %v460_v25 = vld [vmem:[%s975_s4] ss:$0 sm:$0xff] (%p219_p2) }
  0xd4   :  { %309 = vmatpush.msra.mxu1 (%p219_p2), %v286_v21 }
  0xd6   :  { %310 = vmatpush.msra.mxu1 %v285_v22 }
  0xd8   :  { %311 = vmatpush.msra.mxu1 %v284_v23 }
 0x14f   :  { %v281_v24 = vpop.f32.mrf.mxu0 }
 0x150   :  { %420 = vmatmul.msk.f32.vlgmr.msra.gmra.mxu1 %vm292_vm6, %v281_v24 }
 0x1cd   :  { %v313_v26 = vpop.f32.mrf.mxu1 }
 0x1ce   :  { %v314_v27 = vadd.f32 %v460_v25, %v313_v26 }
 0x1d0   :  { %316 = vst [vmem:[#allocation11] sm:$0xff] %v314_v27 }
 0x1d1   :  { %327 = dma.vmem_to_hbm [thread:$0]  %s323_s22, 128, %s325_s23, [#allocation8]  }
 0x1d2   :  { %777 = dma.done.wait [#allocation8], 128  }
 0x1d3   :  { %778 = vsyncadd [#allocation8], 4294967168 }
 0x1d4   :  { %332 = vsyncpa [#allocation7], 1 }
 0x1d5   :  { %333 = vsyncpa [#allocation10], 1 }
 0x1d6   :  { %334 = vsyncpa [#allocation8], 1 }
 0x1d7   :  { %335 = vsyncmov [#allocation3] }
 0x1da   :  { %s336_s24 = vpop.sfrf %335 }
 0x1db   :  { %p421_p0 = scmp.ne.s32.totalorder %s336_s24, 0 }
 0x1dd   :  { %340 = shalt.err (%p421_p0)  }
 0x1de   :  { %342 = vsyncmov [#allocation3 + $0x1] }
 0x1e1   :  { %s343_s4 = vpop.sfrf %342 }
 0x1e2   :  { %p422_p3 = scmp.ne.s32.totalorder %s343_s4, 0 }
 0x1e4   :  { %347 = shalt.err (%p422_p3)  }
 0x1e5   :  { %349 = vsyncmov [#allocation3 + $0x2] }
 0x1e8   :  { %s350_s5 = vpop.sfrf %349 }
 0x1e9   :  { %p423_p4 = scmp.ne.s32.totalorder %s350_s5, 0 }
 0x1eb   :  { %354 = shalt.err (%p423_p4)  }
 0x1ec   :  { %356 = vsyncmov [#allocation3 + $0x3] }
 0x1ef   :  { %s357_s25 = vpop.sfrf %356 }
 0x1f0   :  { %p424_p5 = scmp.ne.s32.totalorder %s357_s25, 0 }
 0x1f2   :  { %361 = shalt.err (%p424_p5)  }
 0x1f3   :  { %363 = vsyncmov [#allocation3 + $0x4] }
 0x1f6   :  { %s364_s11 = vpop.sfrf %363 }
 0x1f7   :  { %p425_p6 = scmp.ne.s32.totalorder %s364_s11, 0 }
 0x1f9   :  { %368 = shalt.err (%p425_p6)  }
 0x1fa   :  { %370 = vsyncmov [#allocation3 + $0x5] }
 0x1fd   :  { %s371_s26 = vpop.sfrf %370 }
 0x1fe   :  { %p426_p7 = scmp.ne.s32.totalorder %s371_s26, 0 }
 0x200   :  { %375 = shalt.err (%p426_p7)  }
 0x201   :  { %377 = vsyncmov [#allocation3 + $0x6] }
 0x204   :  { %s378_s27 = vpop.sfrf %377 }
 0x205   :  { %p427_p8 = scmp.ne.s32.totalorder %s378_s27, 0 }
 0x207   :  { %382 = shalt.err (%p427_p8)  }
 0x208   :  { %384 = vsyncmov [#allocation3 + $0x7] }
 0x20b   :  { %s385_s28 = vpop.sfrf %384 }
 0x20c   :  { %p428_p9 = scmp.ne.s32.totalorder %s385_s28, 0 }
 0x20e   :  { %389 = shalt.err (%p428_p9)  }

</bundles_post_ra>
